<compile_context>
chip_gen: v6e
topology: v6e:2x2x1
jax: 0.10.0
libtpu: 0.0.40
codegen_flags: <defaults>
</compile_context>

<pallas_src>
import functools

import jax
import jax.numpy as jnp
from jax.experimental import pallas as pl
from jax.experimental.pallas import tpu as pltpu


# ---------------------------------------------------------------------------
# Gather kernel:  out[i, j] = p[adj[i, j]]   (p held in SMEM, unrolled selects)
# ---------------------------------------------------------------------------
def dep_gather_kernel(p_ref, adj_ref, out_ref, *, n_types):
    adj = adj_ref[...]                           # [row_tile, C] int32
    acc = jnp.zeros(adj.shape, jnp.float32)      # index 0 (and out-of-range) -> 0
    for n in range(1, n_types):                  # unrolled; n_types is static
        acc = jnp.where(adj == n, p_ref[0, n], acc)
    out_ref[...] = acc


def _tiled_gather(p2d, adj2d, n_types, row_tile=None):
    """Tiled table lookup over a 2-D int32 index slab."""
    R, C = adj2d.shape
    if row_tile is None:
        # Target ~1 MiB per block (lane dim pads to 128 in VMEM), multiple of 8.
        c_pad = pl.cdiv(C, 128) * 128
        row_tile = max(8, ((1 << 20) // (4 * c_pad)) // 8 * 8)
    if R <= row_tile:
        row_tile = R                             # full-dim block is always legal
    grid = (pl.cdiv(R, row_tile),)               # ragged last block: OOB writes dropped

    return pl.pallas_call(
        functools.partial(dep_gather_kernel, n_types=n_types),
        out_shape=jax.ShapeDtypeStruct((R, C), jnp.float32),
        grid=grid,
        in_specs=[
            pl.BlockSpec(memory_space=pltpu.MemorySpace.SMEM),   # p table (whole)
            pl.BlockSpec((row_tile, C), lambda i: (i, 0)),       # adj tile
        ],
        out_specs=pl.BlockSpec((row_tile, C), lambda i: (i, 0)),
        compiler_params=pltpu.CompilerParams(
            dimension_semantics=("parallel",)),                  # independent row tiles
    )(p2d, adj2d)


def dep_type_forward(x, w, b, adj, *, row_tile=None):
    """Pallas forward of DEP_type.

    x:   [N, att_dim] f32   dep-type embeddings (`input` in the torch module)
    w:   [1, att_dim] f32   nn.Linear(att_dim, 1) weight
    b:   [1] f32            nn.Linear bias (cancels under softmax; unused)
    adj: [B, L, L] int      syn_dep_adj
    returns [B, L, L] f32
    """
    del b  # softmax is shift-invariant; the scalar bias has no effect on the output.
    N, _ = x.shape
    B, L, _ = adj.shape
    if adj.dtype != jnp.int32:
        adj = adj.astype(jnp.int32)

    # --- tiny dep-type probability table in the wrapper (per perf review) ---
    scores = x @ w[0]                              # [N]
    p = jax.nn.softmax(scores)
    p = p.at[0].set(0.0)                           # fold `adj == 0 -> 0` into the table
    p2d = p.reshape(1, N).astype(jnp.float32)

    # --- free-bitcast reshape of adj (no pad, no extra HBM pass) ---
    total = B * L * L
    if total % 128 == 0:
        adj2d = adj.reshape(total // 128, 128)     # lane-dense slab
    else:
        adj2d = adj.reshape(B * L, L)              # natural layout, full last dim

    out2d = _tiled_gather(p2d, adj2d, N, row_tile=row_tile)
    return out2d.reshape(B, L, L)


def ref_forward(x, w, b, adj):
    scores = (x @ w.T + b).T                 # [1, N]
    p = jax.nn.softmax(scores, axis=-1)[0]   # [N]
    out = p[adj]                             # [B, L, L]
    return jnp.where(adj == 0, 0.0, out)


if __name__ == "__main__":
    key = jax.random.PRNGKey(0)

    def run_case(B, L, N, D, row_tile=None, case_id=0):
        ks = jax.random.split(jax.random.fold_in(key, case_id), 4)
        x = jax.random.normal(ks[0], (N, D), dtype=jnp.float32)
        w = 0.1 * jax.random.normal(ks[1], (1, D), dtype=jnp.float32)
        b = 0.1 * jax.random.normal(ks[2], (1,), dtype=jnp.float32)
        adj = jax.random.randint(ks[3], (B, L, L), 0, N).astype(jnp.int32)

        out = dep_type_forward(x, w, b, adj, row_tile=row_tile)
        jax.block_until_ready(out)
        ref = ref_forward(x, w, b, adj)
        assert out.shape == (B, L, L)
        assert jnp.allclose(out, ref, atol=1e-5, rtol=1e-5), (B, L, N, D)

    att_dim = 32        # hidden size of dep-type embeddings
    n_dep_types = 16    # N = rows of `input` (dep-type vocabulary)

    # main case: batch=2, overall_max_len=8 (lane-dense single block)
    run_case(2, 8, n_dep_types, att_dim, case_id=0)
    # total not a multiple of 128 -> natural [B*L, L] layout path (no pad copy)
    run_case(2, 7, n_dep_types, att_dim, case_id=1)
    # ragged multi-block lane-dense path (forced small row tile)
    run_case(2, 24, n_dep_types, att_dim, row_tile=8, case_id=2)

    print("KERNEL_OK")
</pallas_src>

<mosaic_0001>
module attributes {stable_mosaic.version = 11 : i64} {
  func.func @dep_gather_kernel(%arg0: i32, %arg1: memref<1x16xf32, #tpu.memory_space<smem>>, %arg2: memref<1x128xi32, #tpu.memory_space<vmem>>, %arg3: memref<1x128xf32, #tpu.memory_space<vmem>>) attributes {dimension_semantics = [#tpu.dimension_semantics<parallel>], iteration_bounds = array<i64: 1>, scalar_prefetch = 0 : i64, scratch_operands = 0 : i64, tpu.core_type = #tpu.core_type<tc>, window_params = [{transform_indices = @transform_0, window_bounds = array<i64: 1, 16>}, {transform_indices = @transform_1, window_bounds = array<i64: 1, 128>}, {transform_indices = @transform_2, window_bounds = array<i64: 1, 128>}]} {
    %c0 = arith.constant 0 : index
    %c0_0 = arith.constant 0 : index
    %0 = vector.load %arg2[%c0, %c0_0] : memref<1x128xi32, #tpu.memory_space<vmem>>, vector<1x128xi32>
    %cst = arith.constant 0.000000e+00 : f32
    %1 = vector.broadcast %cst : f32 to vector<1x128xf32>
    %c1_i32 = arith.constant 1 : i32
    %2 = vector.broadcast %c1_i32 : i32 to vector<1x128xi32>
    %3 = arith.cmpi eq, %0, %2 : vector<1x128xi32>
    %c0_1 = arith.constant 0 : index
    %c1 = arith.constant 1 : index
    %4 = memref.load %arg1[%c0_1, %c1] : memref<1x16xf32, #tpu.memory_space<smem>>
    %5 = vector.broadcast %4 : f32 to vector<1x128xf32>
    %6 = arith.select %3, %5, %1 : vector<1x128xi1>, vector<1x128xf32>
    %c2_i32 = arith.constant 2 : i32
    %7 = vector.broadcast %c2_i32 : i32 to vector<1x128xi32>
    %8 = arith.cmpi eq, %0, %7 : vector<1x128xi32>
    %c0_2 = arith.constant 0 : index
    %c2 = arith.constant 2 : index
    %9 = memref.load %arg1[%c0_2, %c2] : memref<1x16xf32, #tpu.memory_space<smem>>
    %10 = vector.broadcast %9 : f32 to vector<1x128xf32>
    %11 = arith.select %8, %10, %6 : vector<1x128xi1>, vector<1x128xf32>
    %c3_i32 = arith.constant 3 : i32
    %12 = vector.broadcast %c3_i32 : i32 to vector<1x128xi32>
    %13 = arith.cmpi eq, %0, %12 : vector<1x128xi32>
    %c0_3 = arith.constant 0 : index
    %c3 = arith.constant 3 : index
    %14 = memref.load %arg1[%c0_3, %c3] : memref<1x16xf32, #tpu.memory_space<smem>>
    %15 = vector.broadcast %14 : f32 to vector<1x128xf32>
    %16 = arith.select %13, %15, %11 : vector<1x128xi1>, vector<1x128xf32>
    %c4_i32 = arith.constant 4 : i32
    %17 = vector.broadcast %c4_i32 : i32 to vector<1x128xi32>
    %18 = arith.cmpi eq, %0, %17 : vector<1x128xi32>
    %c0_4 = arith.constant 0 : index
    %c4 = arith.constant 4 : index
    %19 = memref.load %arg1[%c0_4, %c4] : memref<1x16xf32, #tpu.memory_space<smem>>
    %20 = vector.broadcast %19 : f32 to vector<1x128xf32>
    %21 = arith.select %18, %20, %16 : vector<1x128xi1>, vector<1x128xf32>
    %c5_i32 = arith.constant 5 : i32
    %22 = vector.broadcast %c5_i32 : i32 to vector<1x128xi32>
    %23 = arith.cmpi eq, %0, %22 : vector<1x128xi32>
    %c0_5 = arith.constant 0 : index
    %c5 = arith.constant 5 : index
    %24 = memref.load %arg1[%c0_5, %c5] : memref<1x16xf32, #tpu.memory_space<smem>>
    %25 = vector.broadcast %24 : f32 to vector<1x128xf32>
    %26 = arith.select %23, %25, %21 : vector<1x128xi1>, vector<1x128xf32>
    %c6_i32 = arith.constant 6 : i32
    %27 = vector.broadcast %c6_i32 : i32 to vector<1x128xi32>
    %28 = arith.cmpi eq, %0, %27 : vector<1x128xi32>
    %c0_6 = arith.constant 0 : index
    %c6 = arith.constant 6 : index
    %29 = memref.load %arg1[%c0_6, %c6] : memref<1x16xf32, #tpu.memory_space<smem>>
    %30 = vector.broadcast %29 : f32 to vector<1x128xf32>
    %31 = arith.select %28, %30, %26 : vector<1x128xi1>, vector<1x128xf32>
    %c7_i32 = arith.constant 7 : i32
    %32 = vector.broadcast %c7_i32 : i32 to vector<1x128xi32>
    %33 = arith.cmpi eq, %0, %32 : vector<1x128xi32>
    %c0_7 = arith.constant 0 : index
    %c7 = arith.constant 7 : index
    %34 = memref.load %arg1[%c0_7, %c7] : memref<1x16xf32, #tpu.memory_space<smem>>
    %35 = vector.broadcast %34 : f32 to vector<1x128xf32>
    %36 = arith.select %33, %35, %31 : vector<1x128xi1>, vector<1x128xf32>
    %c8_i32 = arith.constant 8 : i32
    %37 = vector.broadcast %c8_i32 : i32 to vector<1x128xi32>
    %38 = arith.cmpi eq, %0, %37 : vector<1x128xi32>
    %c0_8 = arith.constant 0 : index
    %c8 = arith.constant 8 : index
    %39 = memref.load %arg1[%c0_8, %c8] : memref<1x16xf32, #tpu.memory_space<smem>>
    %40 = vector.broadcast %39 : f32 to vector<1x128xf32>
    %41 = arith.select %38, %40, %36 : vector<1x128xi1>, vector<1x128xf32>
    %c9_i32 = arith.constant 9 : i32
    %42 = vector.broadcast %c9_i32 : i32 to vector<1x128xi32>
    %43 = arith.cmpi eq, %0, %42 : vector<1x128xi32>
    %c0_9 = arith.constant 0 : index
    %c9 = arith.constant 9 : index
    %44 = memref.load %arg1[%c0_9, %c9] : memref<1x16xf32, #tpu.memory_space<smem>>
    %45 = vector.broadcast %44 : f32 to vector<1x128xf32>
    %46 = arith.select %43, %45, %41 : vector<1x128xi1>, vector<1x128xf32>
    %c10_i32 = arith.constant 10 : i32
    %47 = vector.broadcast %c10_i32 : i32 to vector<1x128xi32>
    %48 = arith.cmpi eq, %0, %47 : vector<1x128xi32>
    %c0_10 = arith.constant 0 : index
    %c10 = arith.constant 10 : index
    %49 = memref.load %arg1[%c0_10, %c10] : memref<1x16xf32, #tpu.memory_space<smem>>
    %50 = vector.broadcast %49 : f32 to vector<1x128xf32>
    %51 = arith.select %48, %50, %46 : vector<1x128xi1>, vector<1x128xf32>
    %c11_i32 = arith.constant 11 : i32
    %52 = vector.broadcast %c11_i32 : i32 to vector<1x128xi32>
    %53 = arith.cmpi eq, %0, %52 : vector<1x128xi32>
    %c0_11 = arith.constant 0 : index
    %c11 = arith.constant 11 : index
    %54 = memref.load %arg1[%c0_11, %c11] : memref<1x16xf32, #tpu.memory_space<smem>>
    %55 = vector.broadcast %54 : f32 to vector<1x128xf32>
    %56 = arith.select %53, %55, %51 : vector<1x128xi1>, vector<1x128xf32>
    %c12_i32 = arith.constant 12 : i32
    %57 = vector.broadcast %c12_i32 : i32 to vector<1x128xi32>
    %58 = arith.cmpi eq, %0, %57 : vector<1x128xi32>
    %c0_12 = arith.constant 0 : index
    %c12 = arith.constant 12 : index
    %59 = memref.load %arg1[%c0_12, %c12] : memref<1x16xf32, #tpu.memory_space<smem>>
    %60 = vector.broadcast %59 : f32 to vector<1x128xf32>
    %61 = arith.select %58, %60, %56 : vector<1x128xi1>, vector<1x128xf32>
    %c13_i32 = arith.constant 13 : i32
    %62 = vector.broadcast %c13_i32 : i32 to vector<1x128xi32>
    %63 = arith.cmpi eq, %0, %62 : vector<1x128xi32>
    %c0_13 = arith.constant 0 : index
    %c13 = arith.constant 13 : index
    %64 = memref.load %arg1[%c0_13, %c13] : memref<1x16xf32, #tpu.memory_space<smem>>
    %65 = vector.broadcast %64 : f32 to vector<1x128xf32>
    %66 = arith.select %63, %65, %61 : vector<1x128xi1>, vector<1x128xf32>
    %c14_i32 = arith.constant 14 : i32
    %67 = vector.broadcast %c14_i32 : i32 to vector<1x128xi32>
    %68 = arith.cmpi eq, %0, %67 : vector<1x128xi32>
    %c0_14 = arith.constant 0 : index
    %c14 = arith.constant 14 : index
    %69 = memref.load %arg1[%c0_14, %c14] : memref<1x16xf32, #tpu.memory_space<smem>>
    %70 = vector.broadcast %69 : f32 to vector<1x128xf32>
    %71 = arith.select %68, %70, %66 : vector<1x128xi1>, vector<1x128xf32>
    %c15_i32 = arith.constant 15 : i32
    %72 = vector.broadcast %c15_i32 : i32 to vector<1x128xi32>
    %73 = arith.cmpi eq, %0, %72 : vector<1x128xi32>
    %c0_15 = arith.constant 0 : index
    %c15 = arith.constant 15 : index
    %74 = memref.load %arg1[%c0_15, %c15] : memref<1x16xf32, #tpu.memory_space<smem>>
    %75 = vector.broadcast %74 : f32 to vector<1x128xf32>
    %76 = arith.select %73, %75, %71 : vector<1x128xi1>, vector<1x128xf32>
    %c0_16 = arith.constant 0 : index
    %c0_17 = arith.constant 0 : index
    %77 = vector.load %arg3[%c0_16, %c0_17] : memref<1x128xf32, #tpu.memory_space<vmem>>, vector<1x128xf32>
    tpu.vector_store %arg3[%c0_16, %c0_17], %76 {strides = array<i32>} : memref<1x128xf32, #tpu.memory_space<vmem>>, vector<1x128xf32>,
    return
  }
  func.func @transform_0(%arg0: i32) -> (i32, i32) {
    %c0_i32 = arith.constant 0 : i32
    %c0_i32_0 = arith.constant 0 : i32
    %c0_i32_1 = arith.constant 0 : i32
    return %c0_i32, %c0_i32_0 : i32, i32
  }
  func.func @transform_1(%arg0: i32) -> (i32, i32) {
    %c0_i32 = arith.constant 0 : i32
    %c0_i32_0 = arith.constant 0 : i32
    return %arg0, %c0_i32 : i32, i32
  }
  func.func @transform_2(%arg0: i32) -> (i32, i32) {
    %c0_i32 = arith.constant 0 : i32
    %c0_i32_0 = arith.constant 0 : i32
    return %arg0, %c0_i32 : i32, i32
  }
}

</mosaic_0001>

<bundles_post_ra>
// kernel: tpu_custom_call.1
= control target key start
LH: loop header
LB: loop body
LE: loop exit
PB: predicated region body
PF: predicated region fallthrough
CT: control target
= control target key end

     0   :  { %7 = vsyncpa [#allocation4], 0  ;;  %s192_s0 = inlined_call_operand.hbm [shape: f32[1,16], index: 0, kind: input, shape index: {}]   ;;  %s193_s1 = inlined_call_operand.vmem [shape: s32[1,128], index: 1, kind: input, shape index: {}]   ;;  %s194_s2 = inlined_call_operand.hbm [shape: f32[1,128], index: 2, kind: output, shape index: {}]  }
   0x1   :  { %8 = vsyncpa [#allocation3], 0  ;;  %s149_s9 = smov [#allocation2]  }
   0x2   :  { %16 = dma.hbm_to_smem %s192_s0, 16, %s149_s9, [#allocation4]  }
   0x3   :  { %145 = dma.done.wait [#allocation4], 16  }
   0x4   :  { %146 = vsyncadd [#allocation4], 4294967280 }
   0x5   :  { %22 = sfence }
   0x6   :  { %s100_s12 = sld [smem:[#allocation2 + $0x1]]  ;;  %v172_v0 = vld [vmem:[%s193_s1] sm:$0x1]  ;;  %s150_s27 = smov [#allocation5]  }
   0x7   :  { %s101_s15 = sld [smem:[#allocation2 + $0x2]]  ;;  %vm24_vm0 = vcmp.eq.s32.totalorder %v172_v0, 1  ;;  %vm28_vm1 = vcmp.eq.s32.totalorder %v172_v0, 2  ;;  %vm32_vm2 = vcmp.eq.s32.totalorder %v172_v0, 3  ;;  %vm36_vm3 = vcmp.eq.s32.totalorder %v172_v0, 4  ;;  %s91_s28 = sshll.u32 %s150_s27, 4  ;;  %s92_s28 = int_to_ptr.vmem [resolvable:$true] %s91_s28 }
   0x8   :  { %s102_s16 = sld [smem:[#allocation2 + $0x3]]  ;;  %vm40_vm4 = vcmp.eq.s32.totalorder %v172_v0, 5  ;;  %vm44_vm5 = vcmp.eq.s32.totalorder %v172_v0, 6  ;;  %vm48_vm6 = vcmp.eq.s32.totalorder %v172_v0, 7  ;;  %vm52_vm7 = vcmp.eq.s32.totalorder %v172_v0, 8  ;;  %s125_s29 = scalar_lea.vmem %s92_s28, 16 }
   0x9   :  { %s103_s17 = sld [smem:[#allocation2 + $0x4]]  ;;  %vm56_vm8 = vcmp.eq.s32.totalorder %v172_v0, 9  ;;  %vm60_vm9 = vcmp.eq.s32.totalorder %v172_v0, 10  ;;  %vm64_vm10 = vcmp.eq.s32.totalorder %v172_v0, 11  ;;  %vm68_vm11 = vcmp.eq.s32.totalorder %v172_v0, 12  ;;  %p126_p0 = scmp.ne.s32.totalorder %s92_s28, %s125_s29 }
   0xa   :  { %s104_s18 = sld [smem:[#allocation2 + $0x5]]  ;;  %vm72_vm12 = vcmp.eq.s32.totalorder %v172_v0, 13  ;;  %vm76_vm13 = vcmp.eq.s32.totalorder %v172_v0, 14  ;;  %vm80_vm14 = vcmp.eq.s32.totalorder %v172_v0, 15  ;;  %s129_s30 = scalar_lea.vmem %s92_s28, 32 }
   0xb   :  { %s105_s19 = sld [smem:[#allocation2 + $0x6]]  ;;  %p130_p1 = scmp.lt.s32.totalorder %s92_s28, %s92_s28 }
   0xc   :  { %v26_v1 = vstv %s100_s12  ;;  %s106_s0 = sld [smem:[#allocation2 + $0x7]]  ;;  %p131_p2 = scmp.lt.s32.totalorder %s129_s30, %s125_s29 }
   0xd   :  { %v27_v2 = vsel %vm24_vm0, %v26_v1, 0.0  ;;  %v30_v3 = vstv %s101_s15  ;;  %s107_s20 = sld [smem:[#allocation2 + $0x8]] }
   0xe   :  { %v31_v4 = vsel %vm28_vm1, %v30_v3, %v27_v2  ;;  %v34_v5 = vstv %s102_s16  ;;  %s108_s1 = sld [smem:[#allocation2 + $0x9]]  ;;  %p132_p3 = por %p131_p2, %p130_p1 }
   0xf   :  { %v35_v6 = vsel %vm32_vm2, %v34_v5, %v31_v4  ;;  %v38_v7 = vstv %s103_s17  ;;  %s109_s21 = sld [smem:[#allocation2 + $0xa]] }
  0x10   :  { %v39_v8 = vsel %vm36_vm3, %v38_v7, %v35_v6  ;;  %v42_v9 = vstv %s104_s18  ;;  %s110_s22 = sld [smem:[#allocation2 + $0xb]]  ;;  %p133_p4 = pnand %p132_p3, %p126_p0 }
  0x11   :  { %v43_v10 = vsel %vm40_vm4, %v42_v9, %v39_v8  ;;  %v46_v11 = vstv %s105_s19  ;;  %s111_s23 = sld [smem:[#allocation2 + $0xc]] }
  0x12   :  { %v47_v12 = vsel %vm44_vm5, %v46_v11, %v43_v10  ;;  %v50_v13 = vstv %s106_s0  ;;  %s112_s24 = sld [smem:[#allocation2 + $0xd]] }
  0x13   :  { %v51_v14 = vsel %vm48_vm6, %v50_v13, %v47_v12  ;;  %v54_v15 = vstv %s107_s20  ;;  %s113_s25 = sld [smem:[#allocation2 + $0xe]] }
  0x14   :  { %v55_v16 = vsel %vm52_vm7, %v54_v15, %v51_v14  ;;  %v58_v17 = vstv %s108_s1  ;;  %s114_s26 = sld [smem:[#allocation2 + $0xf]] }
  0x15   :  { %v59_v18 = vsel %vm56_vm8, %v58_v17, %v55_v16  ;;  %v62_v19 = vstv %s109_s21 }
  0x16   :  { %v63_v20 = vsel %vm60_vm9, %v62_v19, %v59_v18  ;;  %v66_v21 = vstv %s110_s22 }
  0x17   :  { %v67_v22 = vsel %vm64_vm10, %v66_v21, %v63_v20  ;;  %v70_v23 = vstv %s111_s23 }
  0x18   :  { %v71_v24 = vsel %vm68_vm11, %v70_v23, %v67_v22  ;;  %v74_v25 = vstv %s112_s24 }
  0x19   :  { %v75_v26 = vsel %vm72_vm12, %v74_v25, %v71_v24  ;;  %v78_v27 = vstv %s113_s25 }
  0x1a   :  { %v79_v28 = vsel %vm76_vm13, %v78_v27, %v75_v26  ;;  %v82_v29 = vstv %s114_s26 }
  0x1b   :  { %v83_v30 = vsel %vm80_vm14, %v82_v29, %v79_v28 }
  0x1c   :  { %84 = vst [vmem:[#allocation5] sm:$0x1] %v83_v30 }
  0x1d   :  { %136 = shalt.err (!%p133_p4)
}
  0x1e   :  { %94 = dma.vmem_to_hbm [thread:$0]  %s92_s28, 16, %s194_s2, [#allocation3]  }
  0x1f   :  { %147 = dma.done.wait [#allocation3], 16  }
  0x20   :  { %148 = vsyncadd [#allocation3], 4294967280 }
  0x21   :  { %98 = vsyncpa [#allocation3], 1 }
  0x22   :  { %99 = vsyncpa [#allocation4], 1 }

</bundles_post_ra>
